<compile_context>
chip_gen: v5e
topology: v5e:2x2
jax: 0.10.0
libtpu: 0.0.40
codegen_flags: <defaults>
</compile_context>

<pallas_src>
import functools

import jax
import jax.numpy as jnp
from jax.experimental import pallas as pl
from jax.experimental.pallas import tpu as pltpu

LANES = 128  # TPU lane count (fast axis)


def _depth_rel_loss_kernel(src_gt_ref, src_pr_ref, tgt_gt_ref, tgt_pr_ref,
                           out_ref, *, tolerance):
    """One (TILE_R, 128) tile of pairs for one comparison channel.

    out_ref block is (1, 3, TILE_R, 128):
      [0, 0] running sum of ranking (softplus) losses
      [0, 1] running count of ranking pairs (sgn != 0)
      [0, 2] running sum of similarity (diff^2) losses
    The block index depends only on the parallel axis p, so it stays resident in
    VMEM across the whole (r, c) sub-grid of each core.
    """
    r = pl.program_id(1)
    c = pl.program_id(2)

    @pl.when(jnp.logical_and(r == 0, c == 0))
    def _():
        out_ref[...] = jnp.zeros_like(out_ref)

    src_gt = src_gt_ref[...]
    src_pr = src_pr_ref[...]
    tgt_gt = tgt_gt_ref[...]
    tgt_pr = tgt_pr_ref[...]

    # Ordinal sign without a divide (valid for non-negative depths):
    #   src/(tgt+eps) >= 1+tol     <=>  src >= (1+tol)*(tgt+eps)
    #   src/(tgt+eps) <= 1/(1+tol) <=>  (1+tol)*src <= tgt+eps
    t = tgt_gt + 1e-8
    scale = 1.0 + tolerance
    pos = (src_gt >= scale * t).astype(jnp.float32)
    neg = (scale * src_gt <= t).astype(jnp.float32)
    sgn = pos - neg                       # in {-1, 0, +1}
    diff = src_pr - tgt_pr
    nz = jnp.where(sgn != 0.0, 1.0, 0.0)  # ranking pairs (padding has nz == 0)

    # numerically stable softplus(-sgn*diff) == log(1 + exp(-sgn*diff))
    x = -sgn * diff
    loss_rel = jnp.maximum(x, 0.0) + jnp.log(1.0 + jnp.exp(-jnp.abs(x)))
    loss_sim = diff * diff                # padding has diff == 0 -> contributes 0

    out_ref[0, 0] += loss_rel * nz
    out_ref[0, 1] += nz
    out_ref[0, 2] += loss_sim * (1.0 - nz)


def make_pairs(key, H, W, pix_diff, num_comp):
    """Deterministic replacement for __init__ / resample_pairs()."""
    xs = jnp.arange(W, dtype=jnp.int32)
    ys = jnp.arange(H, dtype=jnp.int32)
    gx = jnp.broadcast_to(xs[None, :, None], (H, W, 1))
    gy = jnp.broadcast_to(ys[:, None, None], (H, W, 1))
    grid = jnp.stack([gx, gy], axis=0)                  # (2, H, W, 1); ch0=x, ch1=y
    k1, k2 = jax.random.split(key)
    shift = jax.random.randint(k1, (2, H, W, num_comp), 1, pix_diff + 1, dtype=jnp.int32)
    sign = jax.random.randint(k2, (2, H, W, num_comp), 0, 2, dtype=jnp.int32) * 2 - 1
    gs = grid + shift * sign                            # (2, H, W, num_comp)
    zeros = jnp.zeros_like(gs[0])
    gx_s, gy_s = gs[0], gs[1]
    gx_s = gx_s + 2 * jnp.maximum(-gx_s, zeros)
    gx_s = gx_s - 2 * jnp.maximum(gx_s - (W - 1), zeros)
    gy_s = gy_s + 2 * jnp.maximum(-gy_s, zeros)
    gy_s = gy_s - 2 * jnp.maximum(gy_s - (H - 1), zeros)
    grid_shift = jnp.stack([gx_s, gy_s], axis=0)        # (2, H, W, num_comp)
    return grid, grid_shift


def depth_rel_loss(pred_depth, gt_depth, grid, grid_shift, tolerance=0.05,
                   tile_rows=None):
    """Forward pass of DepthRelLoss.  `grid` is the identity coordinate grid
    (as built by the module), so the src gathers are skipped entirely."""
    del grid  # identity gather -> src values are just the flattened depth maps
    H, W = gt_depth.shape
    C = grid_shift.shape[-1]
    n = H * W

    # ---------------- XLA-side glue: one fused gather for shifted targets --------
    xs = grid_shift[0]                                      # (H, W, C) x coords
    ys = grid_shift[1]                                      # (H, W, C) y coords
    idx = (ys * W + xs).transpose(2, 0, 1).reshape(C, n)    # (C, H*W) flat indices
    stacked = jnp.stack([gt_depth.reshape(n), pred_depth.reshape(n)],
                        axis=0).astype(jnp.float32)         # (2, H*W)
    tgt = stacked[:, idx]                                   # (2, C, H*W), one gather
    tgt_gt_flat, tgt_pr_flat = tgt[0], tgt[1]

    src_gt_flat = gt_depth.reshape(n).astype(jnp.float32)
    src_pr_flat = pred_depth.reshape(n).astype(jnp.float32)

    # ---------------- tiling / padding --------------------------------------------
    rows = pl.cdiv(n, LANES)
    if tile_rows is None:
        # big tiles for real images, shrunk for tiny inputs; must be a multiple of 8
        tile_rows = min(512, ((rows + 7) // 8) * 8)
    TILE_R = tile_rows
    num_tiles = pl.cdiv(rows, TILE_R)
    P = 2 if num_tiles >= 2 else 1            # megacore split (v7x); harmless on 1-TC chips
    num_tiles = ((num_tiles + P - 1) // P) * P
    R = num_tiles // P                        # row tiles per core
    rows_pad = num_tiles * TILE_R
    pad = rows_pad * LANES - n

    # Padding values chosen so padded pairs have sgn == 0 and diff == 0:
    #   gt pads = 1.0 (ratio ~ 1 -> "similar" bucket), pred pads = 0.0 (diff = 0).
    # They therefore contribute nothing to any accumulated sum/count.
    src_gt = jnp.pad(src_gt_flat, (0, pad), constant_values=1.0).reshape(rows_pad, LANES)
    src_pr = jnp.pad(src_pr_flat, (0, pad)).reshape(rows_pad, LANES)
    tgt_gt = jnp.pad(tgt_gt_flat, ((0, 0), (0, pad)),
                     constant_values=1.0).reshape(C, rows_pad, LANES)
    tgt_pr = jnp.pad(tgt_pr_flat, ((0, 0), (0, pad))).reshape(C, rows_pad, LANES)

    # src specs ignore the (innermost) C axis -> the same src tile is reused
    # across all C comparison channels without a re-DMA.
    row_map = lambda p, r, c: (p * R + r, 0)
    tgt_map = lambda p, r, c: (c, p * R + r, 0)

    partials = pl.pallas_call(
        functools.partial(_depth_rel_loss_kernel, tolerance=float(tolerance)),
        out_shape=jax.ShapeDtypeStruct((P, 3, TILE_R, LANES), jnp.float32),
        grid=(P, R, C),
        in_specs=[
            pl.BlockSpec((TILE_R, LANES), row_map),          # src_gt
            pl.BlockSpec((TILE_R, LANES), row_map),          # src_pr
            pl.BlockSpec((None, TILE_R, LANES), tgt_map),    # tgt_gt (C squeezed)
            pl.BlockSpec((None, TILE_R, LANES), tgt_map),    # tgt_pr (C squeezed)
        ],
        out_specs=pl.BlockSpec((1, 3, TILE_R, LANES), lambda p, r, c: (p, 0, 0, 0)),
        compiler_params=pltpu.CompilerParams(
            dimension_semantics=("parallel", "arbitrary", "arbitrary")),
    )(src_gt, src_pr, tgt_gt, tgt_pr)

    # final tiny reduction of the per-core partial accumulators
    sums = jnp.sum(partials, axis=(0, 2, 3))   # [rank_loss_sum, nz_count, sim_loss_sum]
    n_pairs = jnp.float32(n * C)
    nz_count = sums[1]
    # max(count, 1) guards the degenerate empty-bucket case (PyTorch would yield NaN)
    l_rank = sums[0] / jnp.maximum(nz_count, 1.0)
    l_sim = sums[2] / jnp.maximum(n_pairs - nz_count, 1.0)
    return l_rank + l_sim


def reference_loss(pred_depth, gt_depth, grid, grid_shift, tolerance=0.05):
    """Pure-JAX reference reproducing the PyTorch forward."""
    x, y = grid[0], grid[1]
    xs, ys = grid_shift[0], grid_shift[1]
    src_gt = gt_depth[y, x]
    tgt_gt = gt_depth[ys, xs]
    src_pr = pred_depth[y, x]
    tgt_pr = pred_depth[ys, xs]
    rel = src_gt / (tgt_gt + 1e-8)
    pos = (rel >= 1.0 + tolerance).astype(jnp.float32)
    neg = (rel <= 1.0 / (1.0 + tolerance)).astype(jnp.float32)
    sgn = pos - neg
    diff = src_pr - tgt_pr
    nz = sgn != 0.0
    loss = jnp.log(1.0 + jnp.exp(-sgn * diff))
    l_rank = jnp.sum(jnp.where(nz, loss, 0.0)) / jnp.sum(nz.astype(jnp.float32))
    l_sim = jnp.sum(jnp.where(~nz, diff * diff, 0.0)) / jnp.sum((~nz).astype(jnp.float32))
    return l_rank + l_sim


if __name__ == "__main__":
    pix_diff, tolerance = 10, 0.05
    key = jax.random.PRNGKey(0)

    # (H, W, num_comp, tile_rows):
    #  - small default path (single tile, P=1, auto tile size)
    #  - tiny forced tiles to exercise the multi-row-tile + 2-way parallel split
    configs = [
        (16, 16, 3, None),
        (64, 48, 3, 8),
    ]

    for H, W, num_comp, tile_rows in configs:
        key, k_pairs, k_gt, k_pred = jax.random.split(key, 4)
        grid, grid_shift = make_pairs(k_pairs, H, W, pix_diff, num_comp)
        gt_depth = jax.random.uniform(k_gt, (H, W), jnp.float32, 0.5, 5.0)
        pred_depth = jax.random.uniform(k_pred, (H, W), jnp.float32, 0.5, 5.0)

        loss = depth_rel_loss(pred_depth, gt_depth, grid, grid_shift,
                              tolerance=tolerance, tile_rows=tile_rows)
        loss = jax.block_until_ready(loss)

        ref = reference_loss(pred_depth, gt_depth, grid, grid_shift, tolerance)
        assert jnp.isfinite(loss), "kernel produced non-finite loss"
        assert abs(float(loss) - float(ref)) < 1e-4, (H, W, float(loss), float(ref))

    print("KERNEL_OK")
</pallas_src>

<mosaic_0001>
module attributes {stable_mosaic.version = 11 : i64} {
  func.func @_depth_rel_loss_kernel(%arg0: i32, %arg1: i32, %arg2: i32, %arg3: memref<8x128xf32, #tpu.memory_space<vmem>>, %arg4: memref<8x128xf32, #tpu.memory_space<vmem>>, %arg5: memref<1x8x128xf32, #tpu.memory_space<vmem>>, %arg6: memref<1x8x128xf32, #tpu.memory_space<vmem>>, %arg7: memref<1x3x8x128xf32, #tpu.memory_space<vmem>>) attributes {dimension_semantics = [#tpu.dimension_semantics<parallel>, #tpu.dimension_semantics<arbitrary>, #tpu.dimension_semantics<arbitrary>], iteration_bounds = array<i64: 1, 1, 3>, scalar_prefetch = 0 : i64, scratch_operands = 0 : i64, tpu.core_type = #tpu.core_type<tc>, window_params = [{transform_indices = @transform_0, window_bounds = array<i64: 8, 128>}, {transform_indices = @transform_1, window_bounds = array<i64: 8, 128>}, {transform_indices = @transform_2, window_bounds = array<i64: 1, 8, 128>}, {transform_indices = @transform_3, window_bounds = array<i64: 1, 8, 128>}, {transform_indices = @transform_4, window_bounds = array<i64: 1, 3, 8, 128>}]} {
    %c0_i32 = arith.constant 0 : i32
    %0 = arith.cmpi eq, %arg1, %c0_i32 : i32
    %c0_i32_0 = arith.constant 0 : i32
    %1 = arith.cmpi eq, %arg2, %c0_i32_0 : i32
    %2 = arith.andi %0, %1 : i1
    %3 = arith.extui %2 : i1 to i32
    %c0_i32_1 = arith.constant 0 : i32
    %4 = arith.cmpi ne, %3, %c0_i32_1 : i32
    scf.if %4 {
      %cst_43 = arith.constant 0.000000e+00 : f32
      %66 = vector.broadcast %cst_43 : f32 to vector<1x3x8x128xf32>
      %c0_44 = arith.constant 0 : index
      %c0_45 = arith.constant 0 : index
      %c0_46 = arith.constant 0 : index
      %c0_47 = arith.constant 0 : index
      %67 = vector.load %arg7[%c0_44, %c0_45, %c0_46, %c0_47] : memref<1x3x8x128xf32, #tpu.memory_space<vmem>>, vector<1x3x8x128xf32>
      tpu.vector_store %arg7[%c0_44, %c0_45, %c0_46, %c0_47], %66 {strides = array<i32>} : memref<1x3x8x128xf32, #tpu.memory_space<vmem>>, vector<1x3x8x128xf32>,
    } else {
    }
    %c0 = arith.constant 0 : index
    %c0_2 = arith.constant 0 : index
    %5 = vector.load %arg3[%c0, %c0_2] : memref<8x128xf32, #tpu.memory_space<vmem>>, vector<8x128xf32>
    %c0_3 = arith.constant 0 : index
    %c0_4 = arith.constant 0 : index
    %6 = vector.load %arg4[%c0_3, %c0_4] : memref<8x128xf32, #tpu.memory_space<vmem>>, vector<8x128xf32>
    %c0_5 = arith.constant 0 : index
    %c0_6 = arith.constant 0 : index
    %c0_7 = arith.constant 0 : index
    %7 = vector.load %arg5[%c0_5, %c0_6, %c0_7] : memref<1x8x128xf32, #tpu.memory_space<vmem>>, vector<1x8x128xf32>
    %8 = vector.shape_cast %7 : vector<1x8x128xf32> to vector<8x128xf32>
    %c0_8 = arith.constant 0 : index
    %c0_9 = arith.constant 0 : index
    %c0_10 = arith.constant 0 : index
    %9 = vector.load %arg6[%c0_8, %c0_9, %c0_10] : memref<1x8x128xf32, #tpu.memory_space<vmem>>, vector<1x8x128xf32>
    %10 = vector.shape_cast %9 : vector<1x8x128xf32> to vector<8x128xf32>
    %cst = arith.constant 9.99999993E-9 : f32
    %11 = vector.broadcast %cst : f32 to vector<8x128xf32>
    %12 = arith.addf %8, %11 : vector<8x128xf32>
    %cst_11 = arith.constant 1.050000e+00 : f32
    %13 = vector.broadcast %cst_11 : f32 to vector<8x128xf32>
    %14 = arith.mulf %13, %12 : vector<8x128xf32>
    %15 = arith.cmpf oge, %5, %14 : vector<8x128xf32>
    %16 = arith.extui %15 : vector<8x128xi1> to vector<8x128xi32>
    %17 = arith.sitofp %16 : vector<8x128xi32> to vector<8x128xf32>
    %cst_12 = arith.constant 1.050000e+00 : f32
    %18 = vector.broadcast %cst_12 : f32 to vector<8x128xf32>
    %19 = arith.mulf %18, %5 : vector<8x128xf32>
    %20 = arith.cmpf ole, %19, %12 : vector<8x128xf32>
    %21 = arith.extui %20 : vector<8x128xi1> to vector<8x128xi32>
    %22 = arith.sitofp %21 : vector<8x128xi32> to vector<8x128xf32>
    %23 = arith.subf %17, %22 : vector<8x128xf32>
    %24 = arith.subf %6, %10 : vector<8x128xf32>
    %cst_13 = arith.constant 0.000000e+00 : f32
    %25 = vector.broadcast %cst_13 : f32 to vector<8x128xf32>
    %26 = arith.cmpf one, %23, %25 : vector<8x128xf32>
    %cst_14 = arith.constant 1.000000e+00 : f32
    %cst_15 = arith.constant 0.000000e+00 : f32
    %27 = vector.broadcast %cst_14 : f32 to vector<8x128xf32>
    %28 = vector.broadcast %cst_15 : f32 to vector<8x128xf32>
    %29 = arith.select %26, %27, %28 : vector<8x128xi1>, vector<8x128xf32>
    %cst_16 = arith.constant 0.000000e+00 : f32
    %30 = vector.broadcast %cst_16 : f32 to vector<8x128xf32>
    %31 = arith.subf %30, %23 : vector<8x128xf32>
    %32 = arith.mulf %31, %24 : vector<8x128xf32>
    %cst_17 = arith.constant 0.000000e+00 : f32
    %33 = vector.broadcast %cst_17 : f32 to vector<8x128xf32>
    %34 = arith.maximumf %32, %33 : vector<8x128xf32>
    %35 = math.absf %32 : vector<8x128xf32>
    %cst_18 = arith.constant 0.000000e+00 : f32
    %36 = vector.broadcast %cst_18 : f32 to vector<8x128xf32>
    %37 = arith.subf %36, %35 : vector<8x128xf32>
    %38 = math.exp %37 : vector<8x128xf32>
    %cst_19 = arith.constant 1.000000e+00 : f32
    %39 = vector.broadcast %cst_19 : f32 to vector<8x128xf32>
    %40 = arith.addf %39, %38 : vector<8x128xf32>
    %41 = math.log %40 : vector<8x128xf32>
    %42 = arith.addf %34, %41 : vector<8x128xf32>
    %43 = arith.mulf %24, %24 : vector<8x128xf32>
    %c0_20 = arith.constant 0 : index
    %c0_21 = arith.constant 0 : index
    %c0_22 = arith.constant 0 : index
    %c0_23 = arith.constant 0 : index
    %44 = vector.load %arg7[%c0_20, %c0_21, %c0_22, %c0_23] : memref<1x3x8x128xf32, #tpu.memory_space<vmem>>, vector<1x1x8x128xf32>
    %45 = vector.shape_cast %44 : vector<1x1x8x128xf32> to vector<8x128xf32>
    %46 = arith.mulf %42, %29 : vector<8x128xf32>
    %47 = arith.addf %45, %46 : vector<8x128xf32>
    %c0_24 = arith.constant 0 : index
    %c0_25 = arith.constant 0 : index
    %c0_26 = arith.constant 0 : index
    %c0_27 = arith.constant 0 : index
    %48 = vector.load %arg7[%c0_24, %c0_25, %c0_26, %c0_27] : memref<1x3x8x128xf32, #tpu.memory_space<vmem>>, vector<1x1x8x128xf32>
    %49 = vector.shape_cast %48 : vector<1x1x8x128xf32> to vector<8x128xf32>
    %50 = vector.shape_cast %47 : vector<8x128xf32> to vector<1x1x8x128xf32>
    tpu.vector_store %arg7[%c0_24, %c0_25, %c0_26, %c0_27], %50 {strides = array<i32>} : memref<1x3x8x128xf32, #tpu.memory_space<vmem>>, vector<1x1x8x128xf32>,
    %c0_28 = arith.constant 0 : index
    %c1 = arith.constant 1 : index
    %c0_29 = arith.constant 0 : index
    %c0_30 = arith.constant 0 : index
    %51 = vector.load %arg7[%c0_28, %c1, %c0_29, %c0_30] : memref<1x3x8x128xf32, #tpu.memory_space<vmem>>, vector<1x1x8x128xf32>
    %52 = vector.shape_cast %51 : vector<1x1x8x128xf32> to vector<8x128xf32>
    %53 = arith.addf %52, %29 : vector<8x128xf32>
    %c0_31 = arith.constant 0 : index
    %c1_32 = arith.constant 1 : index
    %c0_33 = arith.constant 0 : index
    %c0_34 = arith.constant 0 : index
    %54 = vector.load %arg7[%c0_31, %c1_32, %c0_33, %c0_34] : memref<1x3x8x128xf32, #tpu.memory_space<vmem>>, vector<1x1x8x128xf32>
    %55 = vector.shape_cast %54 : vector<1x1x8x128xf32> to vector<8x128xf32>
    %56 = vector.shape_cast %53 : vector<8x128xf32> to vector<1x1x8x128xf32>
    tpu.vector_store %arg7[%c0_31, %c1_32, %c0_33, %c0_34], %56 {strides = array<i32>} : memref<1x3x8x128xf32, #tpu.memory_space<vmem>>, vector<1x1x8x128xf32>,
    %c0_35 = arith.constant 0 : index
    %c2 = arith.constant 2 : index
    %c0_36 = arith.constant 0 : index
    %c0_37 = arith.constant 0 : index
    %57 = vector.load %arg7[%c0_35, %c2, %c0_36, %c0_37] : memref<1x3x8x128xf32, #tpu.memory_space<vmem>>, vector<1x1x8x128xf32>
    %58 = vector.shape_cast %57 : vector<1x1x8x128xf32> to vector<8x128xf32>
    %cst_38 = arith.constant 1.000000e+00 : f32
    %59 = vector.broadcast %cst_38 : f32 to vector<8x128xf32>
    %60 = arith.subf %59, %29 : vector<8x128xf32>
    %61 = arith.mulf %43, %60 : vector<8x128xf32>
    %62 = arith.addf %58, %61 : vector<8x128xf32>
    %c0_39 = arith.constant 0 : index
    %c2_40 = arith.constant 2 : index
    %c0_41 = arith.constant 0 : index
    %c0_42 = arith.constant 0 : index
    %63 = vector.load %arg7[%c0_39, %c2_40, %c0_41, %c0_42] : memref<1x3x8x128xf32, #tpu.memory_space<vmem>>, vector<1x1x8x128xf32>
    %64 = vector.shape_cast %63 : vector<1x1x8x128xf32> to vector<8x128xf32>
    %65 = vector.shape_cast %62 : vector<8x128xf32> to vector<1x1x8x128xf32>
    tpu.vector_store %arg7[%c0_39, %c2_40, %c0_41, %c0_42], %65 {strides = array<i32>} : memref<1x3x8x128xf32, #tpu.memory_space<vmem>>, vector<1x1x8x128xf32>,
    return
  }
  func.func @transform_0(%arg0: i32, %arg1: i32, %arg2: i32) -> (i32, i32) {
    %c1_i32 = arith.constant 1 : i32
    %0 = arith.muli %arg0, %c1_i32 : i32
    %1 = arith.addi %0, %arg1 : i32
    %c0_i32 = arith.constant 0 : i32
    %c0_i32_0 = arith.constant 0 : i32
    return %1, %c0_i32 : i32, i32
  }
  func.func @transform_1(%arg0: i32, %arg1: i32, %arg2: i32) -> (i32, i32) {
    %c1_i32 = arith.constant 1 : i32
    %0 = arith.muli %arg0, %c1_i32 : i32
    %1 = arith.addi %0, %arg1 : i32
    %c0_i32 = arith.constant 0 : i32
    %c0_i32_0 = arith.constant 0 : i32
    return %1, %c0_i32 : i32, i32
  }
  func.func @transform_2(%arg0: i32, %arg1: i32, %arg2: i32) -> (i32, i32, i32) {
    %c1_i32 = arith.constant 1 : i32
    %0 = arith.muli %arg0, %c1_i32 : i32
    %1 = arith.addi %0, %arg1 : i32
    %c0_i32 = arith.constant 0 : i32
    %c0_i32_0 = arith.constant 0 : i32
    return %arg2, %1, %c0_i32 : i32, i32, i32
  }
  func.func @transform_3(%arg0: i32, %arg1: i32, %arg2: i32) -> (i32, i32, i32) {
    %c1_i32 = arith.constant 1 : i32
    %0 = arith.muli %arg0, %c1_i32 : i32
    %1 = arith.addi %0, %arg1 : i32
    %c0_i32 = arith.constant 0 : i32
    %c0_i32_0 = arith.constant 0 : i32
    return %arg2, %1, %c0_i32 : i32, i32, i32
  }
  func.func @transform_4(%arg0: i32, %arg1: i32, %arg2: i32) -> (i32, i32, i32, i32) {
    %c0_i32 = arith.constant 0 : i32
    %c0_i32_0 = arith.constant 0 : i32
    %c0_i32_1 = arith.constant 0 : i32
    %c0_i32_2 = arith.constant 0 : i32
    return %arg0, %c0_i32, %c0_i32_0, %c0_i32_1 : i32, i32, i32, i32
  }
}

</mosaic_0001>

<bundles_post_ra>
// kernel: tpu_custom_call.1
= control target key start
LH: loop header
LB: loop body
LE: loop exit
PB: predicated region body
PF: predicated region fallthrough
CT: control target
= control target key end

     0   :  { %s1007_s0 = inlined_call_operand.hbm [shape: f32[8,128], index: 0, kind: input, shape index: {}]   ;;  %s1008_s1 = inlined_call_operand.hbm [shape: f32[8,128], index: 1, kind: input, shape index: {}]   ;;  %s1009_s2 = inlined_call_operand.hbm [shape: f32[3,8,128], index: 2, kind: input, shape index: {}]   ;;  %s1010_s3 = inlined_call_operand.hbm [shape: f32[3,8,128], index: 3, kind: input, shape index: {}]   ;;  %s1011_s4 = inlined_call_operand.hbm [shape: f32[1,3,8,128], index: 4, kind: output, shape index: {}]  }
   0x1   :  { %1013 = sst [smem:[#allocation15_spill]] %s1007_s0 }
   0x2   :  { %1014 = sst [smem:[#allocation16_spill]] %s1009_s2 }
   0x3   :  { %9 = vsyncpa [#allocation3], 0 }
   0x4   :  { %10 = vsyncpa [#allocation6], 0 }
   0x5   :  { %11 = vsyncpa [#allocation4], 0  ;;  %s867_s15 = smov 0   ;;  %s869_s16 = smov 0  }
   0x6   :  { %s871_s17 = smov 0   ;;  %s873_s18 = smov 0  }
   0x7   :  { %s875_s19 = smov 0   ;;  %s877_s20 = smov 0  }
   0x8 LB: > { %s896_s21 = sadd.s32 4294967295, %s833_s20   ;;  %p116_p0 = scmp.ne.s32.totalorder %s817_s16, %s813_s15  ;;  %s833_s20 = sphi %s877_s20, %s17_s20   ;;  %s829_s19 = sphi %s875_s19, %s1028_s19   ;;  %s825_s18 = sphi %s873_s18, %s1027_s18   ;;  %s821_s17 = sphi %s871_s17, %s1026_s17   ;;  %s817_s16 = sphi %s869_s16, %s1025_s16   ;;  %s813_s15 = sphi %s867_s15, %s1024_s15  }
   0x9   : > { %p117_p1 = scmp.eq.s32.totalorder %s896_s21, 0  ;;  %p506_p2 = scmp.ge.s32.totalorder %s833_s20, 1 }
   0xa   : > { %p183_p3 = scmp.lt.s32.totalorder %s833_s20, 4  ;;  %s1016_s0 = sld [smem:[#allocation15_spill]] }
   0xb   : > { %p904_p4 = por %p117_p1, %p116_p0  ;;  %s835_s27 = smov [#allocation2]  }
   0xc   : > { %p911_p5 = pnand %p506_p2, %p183_p3  ;;  %s200_s28 = sshll.u32 %s835_s27, 4  ;;  %s201_s28 = int_to_ptr.vmem [resolvable:$true] %s200_s28 }
   0xd   : > { %s29_s30 = sadd.s32 1, %s829_s19  ;;  %s103_s5 = sadd.s32 1, %s821_s17 }
   0xe   : > { %p543_p6 = pneg %p911_p5  ;;  %p30_p8 = scmp.ge.s32.totalorder %s29_s30, 3 }
   0xf   : > { %p110_p9 = scmp.ne.s32.totalorder %s821_s17, %s817_s16  ;;  %p111_p10 = scmp.eq.s32.totalorder %s833_s20, 0 }
  0x10   : > { %s198_s25 = sshll.u32 %s1016_s0, 4  ;;  %p919_p7 = pnand %p543_p6, %p117_p1  ;;  %s199_s25 = int_to_ptr.hbm [resolvable:$true] %s198_s25 }
  0x11   : > { %s1030_s30 = smov (%p30_p8, %s29_s30), 0  ;;  %p932_p11 = por %p111_p10, %p110_p9 }
  0x12   : > { %546 = dma.hbm_to_vmem [thread:$0]  (!%p919_p7), %s199_s25, 128, %s201_s28, [#allocation3]  }
  0x13   : > { %1019 = sst [smem:[#allocation14_spill]] %s1030_s30  ;;  %p559_p12 = scmp.lt.s32.totalorder %s833_s20, 3 }
  0x14   : > { %s98_s7 = ssub.s32 %s829_s19, %s1030_s30  ;;  %s226_s8 = sand.u32 1, %s833_s20  }
  0x15   : > { %p101_p13 = scmp.eq.s32.totalorder %s98_s7, 0  ;;  %s228_s9 = sand.u32 1, %s821_s17  }
  0x16   : > { %s511_s10 = sshll.u32 %s829_s19, 3  ;;  %s510_s12 = sshll.u32 %s228_s9, 3 }
  0x17   : > { %s943_s11 = scalar_select %p101_p13, %s821_s17, %s103_s5  }
  0x18   : > { %s1021_s2 = sld [smem:[#allocation16_spill]]  ;;  %s230_s24 = scalar_lea.vmem [#allocation7], %s510_s12 }
  0x19   : > { %s240_s25 = sshll.u32 %s230_s24, 4  ;;  %p952_p0 = pnand %p559_p12, %p932_p11  ;;  %s241_s25 = int_to_ptr.vmem [resolvable:$true] %s240_s25 }
  0x1a   : > { %s213_s7 = sshll.u32 %s1008_s1, 4  ;;  %s227_s9 = scalar_lea.sflag [#allocation3], %s226_s8  ;;  %s214_s7 = int_to_ptr.hbm [resolvable:$true] %s213_s7 }
  0x1b   : > { %s836_s13 = smov [#allocation5]   ;;  %s257_s24 = scalar_lea.hbm %s1010_s3, %s511_s10 }
  0x1c   : > { %s215_s14 = sshll.u32 %s836_s13, 4  ;;  %s259_s0 = sshll.u32 %s257_s24, 4  ;;  %s216_s14 = int_to_ptr.vmem [resolvable:$true] %s215_s14  ;;  %s260_s0 = int_to_ptr.hbm [resolvable:$true] %s259_s0 }
  0x1d   : > { %549 = dma.hbm_to_vmem [thread:$0]  (!%p919_p7), %s214_s7, 128, %s216_s14, [#allocation6]  }
  0x1e   : > { %s236_s15 = scalar_lea.hbm %s1021_s2, %s511_s10  ;;  %s251_s2 = scalar_lea.vmem [#allocation8], %s510_s12 }
  0x1f   : > { %s238_s23 = sshll.u32 %s236_s15, 4  ;;  %s261_s30 = sshll.u32 %s251_s2, 4  ;;  %s239_s23 = int_to_ptr.hbm [resolvable:$true] %s238_s23  ;;  %s262_s30 = int_to_ptr.vmem [resolvable:$true] %s261_s30 }
  0x20   : > { %553 = dma.hbm_to_vmem [thread:$0]  (!%p952_p0), %s239_s23, 128, %s241_s25, %s227_s9  }
  0x21   : > { %556 = dma.hbm_to_vmem [thread:$0]  (!%p952_p0), %s260_s0, 128, %s262_s30, %s227_s9  }
  0x22   : > { %270 = sbr.rel (%p911_p5) target bundleno = 100 (0x64), region = 36 }
  0x27   : > { %796 = dma.done.wait (%p117_p1), [#allocation3], 128  }
  0x28   : > { %798 = vsyncadd (%p117_p1), [#allocation3], 4294967168 }
  0x29   : > { %800 = dma.done.wait (%p117_p1), [#allocation6], 128  }
  0x2a   : > { %802 = vsyncadd (%p117_p1), [#allocation6], 4294967168  ;;  %s282_s2 = sand.u32 1, %s896_s21   ;;  %s284_s0 = sand.u32 1, %s817_s16  }
  0x2b   : > { %s517_s29 = sshll.u32 %s284_s0, 3  ;;  %s283_s26 = scalar_lea.sflag [#allocation3], %s282_s2 }
  0x2c   : > { %s286_s30 = scalar_lea.vmem [#allocation7], %s517_s29 }
  0x2d   : > { %804 = dma.done.wait (%p904_p4), %s283_s26, 256  }
  0x2e   : > { %806 = vsyncadd (%p904_p4), %s283_s26, 4294967040  ;;  %p327_p2 = scmp.eq.s32.totalorder %s825_s18, 0  ;;  %s296_s8 = scalar_lea.vmem [#allocation8], %s517_s29 }
  0x2f   : > { %v837_v0 = vmov (%p327_p2), 0.0  }
  0x30   : > { %331 = sbr.rel (!%p327_p2) target bundleno = 53 (0x35), region = 56  ;;  %332 = vst [vmem:[#allocation9] sm:$0xff] (%p327_p2), %v837_v0 }
  0x31   : > { %333 = vst [vmem:[#allocation9 + $0x8] sm:$0xff] (%p327_p2), %v837_v0 }
  0x32   : > { %334 = vst [vmem:[#allocation9 + $0x10] sm:$0xff] (%p327_p2), %v837_v0 }
  0x35 PF: > { %v335_v1 = vld [vmem:[#allocation2] sm:$0xff]  ;;  %v337_v2 = vld [vmem:[%s286_s30] sm:$0xff]  ;;  %v336_v6 = vld [vmem:[#allocation5] sm:$0xff]  ;;  %v838_v8 = vmov 0.0   ;;  %s839_s18 = smov [#allocation9]   ;;  %s388_s23 = sshll.u32 %s1011_s4, 4  ;;  %s389_s23 = int_to_ptr.hbm [resolvable:$true] %s388_s23 }
  0x36   : > { %v339_v3 = vadd.f32 1e-08, %v337_v2  ;;  %v344_v4 = vmul.f32 1.05, %v335_v1  ;;  %v338_v7 = vld [vmem:[%s296_s8] sm:$0xff]  ;;  %s386_s22 = sshll.u32 %s839_s18, 4  ;;  %s387_s22 = int_to_ptr.vmem [resolvable:$true] %s386_s22 }
  0x37   : > { %v349_v12 = vsub.f32 %v336_v6, %v338_v7  ;;  %v364_v32 = vld [vmem:[#allocation9] sm:$0xff]  ;;  %p562_p1 = scmp.eq.s32.totalorder %s896_s21, 2  ;;  %s840_s25 = smov 128  }
  0x38   : > { %v340_v5 = vmul.f32 1.05, %v339_v3  ;;  %vm345_vm0 = vcmp.le.f32.partialorder %v344_v4, %v339_v3  ;;  %v369_v13 = vld [vmem:[#allocation9 + $0x8] sm:$0xff]  ;;  %s841_s27 = smov 8  }
  0x39   : > { %v521_v9 = vsel %vm345_vm0, 1.0, %v838_v8  ;;  %v363_v15 = vmul.f32 %v349_v12, %v349_v12  ;;  %v373_v20 = vld [vmem:[#allocation9 + $0x10] sm:$0xff] }
  0x3a   : > { %vm341_vm1 = vcmp.ge.f32.partialorder %v335_v1, %v340_v5 }
  0x3b   : > { %v520_v10 = vsel %vm341_vm1, 1.0, %v838_v8 }
  0x3c   : > { %v348_v11 = vsub.f32 %v520_v10, %v521_v9 }
  0x3e   : > { %vm350_vm2 = vcmp.ne.f32.partialorder %v348_v11, 0.0  ;;  %v352_v14 = vsub.f32 0.0, %v348_v11 }
  0x3f   : > { %v351_v16 = vsel %vm350_vm2, 1.0, %v838_v8 }
  0x40   : > { %v353_v17 = vmul.f32 %v352_v14, %v349_v12  ;;  %v370_v18 = vadd.f32 %v369_v13, %v351_v16  ;;  %v374_v19 = vsub.f32 1.0, %v351_v16 }
  0x42   : > { %v355_v21 = vand.u32 2147483647, %v353_v17  ;;  %371 = vst [vmem:[#allocation9 + $0x8] sm:$0xff] %v370_v18  ;;  %v375_v22 = vmul.f32 %v374_v19, %v363_v15  ;;  %v354_v28 = vmax.f32 %v353_v17, 0.0 }
  0x44   : > { %v356_v23 = vsub.f32 0.0, %v355_v21  ;;  %v376_v24 = vadd.f32 %v375_v22, %v373_v20 }
  0x46   : > { %v357_v25 = vmul.f32 1.442695, %v356_v23  ;;  %377 = vst [vmem:[#allocation9 + $0x10] sm:$0xff] %v376_v24 }
  0x48   : > { %619 = vpow2.f32 %v357_v25 }
  0x4e   : > { %v620_v26 = vpop.eup %619 }
  0x4f   : > { %v359_v27 = vadd.f32 1.0, %v620_v26 }
  0x51   : > { %621 = vlog2.f32 %v359_v27 }
  0x57   : > { %v622_v29 = vpop.eup %621 }
  0x58   : > { %v361_v30 = vmul.f32 0.6931472, %v622_v29 }
  0x5a   : > { %v362_v31 = vadd.f32 %v361_v30, %v354_v28 }
  0x5c   : > { %v365_v33 = vmul.f32 %v362_v31, %v351_v16 }
  0x5e   : > { %v366_v34 = vadd.f32 %v365_v33, %v364_v32 }
  0x60   : > { %367 = vst [vmem:[#allocation9] sm:$0xff] %v366_v34 }
  0x61   : > { %540 = dma.vmem_to_hbm [thread:$0]  (%p562_p1), %s387_s22, 384, %s389_s23, [#allocation4], %s840_s25, %s840_s25, %s841_s27  }
  0x62   : > { %808 = dma.done.wait (%p562_p1), [#allocation4], 384  }
  0x63   : > { %810 = vsyncadd (%p562_p1), [#allocation4], 4294966912 }
  0x64 PF: > { %s17_s20 = sadd.s32 1, %s833_s20   ;;  %s1023_s28 = sld [smem:[#allocation14_spill]] }
  0x65   : > { %p14_p3 = scmp.ge.s32.totalorder %s17_s20, 5   ;;  %s1024_s15 = smov %s817_s16 }
  0x66   : > { %s1025_s16 = smov %s821_s17  ;;  %s1026_s17 = smov %s943_s11 }
  0x67   : > { %s1027_s18 = smov %s829_s19  ;;  %16 = sbr.rel (!%p14_p3) target bundleno = 8 (0x8), region = 100 }
  0x6a   : > { %s1028_s19 = smov %s1023_s28 }
  0x6c   :  { %405 = vsyncpa [#allocation3], 1 }
  0x6d   :  { %407 = vsyncpa [#allocation3 + $0x1], 1 }
  0x6e   :  { %408 = vsyncpa [#allocation6], 1 }
  0x6f   :  { %409 = vsyncpa [#allocation4], 1 }
  0x70   :  { %411 = vsyncpa [#allocation4 + $0x1], 1 }

</bundles_post_ra>
